<compile_context>
chip_gen: v5e
topology: v5e:2x2
jax: 0.10.0
libtpu: 0.0.40
codegen_flags: <defaults>
</compile_context>

<pallas_src>
import jax
import jax.numpy as jnp
import numpy as np
from jax.experimental import pallas as pl
from jax.experimental.pallas import tpu as pltpu


def _linear_kernel(x_ref, w_ref, b_ref, o_ref):
    # x_ref: (B, K)   w_ref: (K, tn)   b_ref: (1, tn)   o_ref: (B, tn)
    acc = jnp.dot(x_ref[...], w_ref[...], preferred_element_type=jnp.float32)
    o_ref[...] = (acc + b_ref[...]).astype(o_ref.dtype)


def icm_target_forward(encoded_next_state, weight, bias, *, tn=128,
                       weight_dtype=None):
    """PyTorch nn.Linear semantics: y = x @ weight.T + bias.

    weight: (out_features, in_features)   (torch layout)
    bias:   (out_features,)
    weight_dtype: optional narrow streaming dtype (e.g. jnp.bfloat16);
                  accumulation stays f32 on the MXU.
    """
    x = encoded_next_state
    B, K = x.shape
    N = weight.shape[0]
    assert weight.shape == (N, K), weight.shape

    w = weight.T                                   # (K, N), lane-dense along N
    if weight_dtype is not None:
        w = w.astype(weight_dtype)
        x = x.astype(weight_dtype)
    b2 = bias.reshape(1, N).astype(jnp.float32)

    if N % tn == 0 and tn % 128 == 0:
        grid = (N // tn,)
        in_specs = [pl.BlockSpec((B, K), lambda j: (0, 0)),
                    pl.BlockSpec((K, tn), lambda j: (0, j)),
                    pl.BlockSpec((1, tn), lambda j: (0, j))]
        out_specs = pl.BlockSpec((B, tn), lambda j: (0, j))
    else:
        grid = (1,)
        in_specs = [pl.BlockSpec((B, K), lambda j: (0, 0)),
                    pl.BlockSpec((K, N), lambda j: (0, 0)),
                    pl.BlockSpec((1, N), lambda j: (0, 0))]
        out_specs = pl.BlockSpec((B, N), lambda j: (0, 0))

    return pl.pallas_call(
        _linear_kernel,
        out_shape=jax.ShapeDtypeStruct((B, N), jnp.float32),
        grid=grid,
        in_specs=in_specs,
        out_specs=out_specs,
        compiler_params=pltpu.CompilerParams(
            dimension_semantics=("parallel",)),
    )(x, w, b2)


if __name__ == "__main__":
    key = jax.random.PRNGKey(0)
    kx, kw, kb = jax.random.split(key, 3)

    BATCH = 8
    ENCODED = 64      # encoded_next_state_size
    OUT = 256         # output_size

    x = jax.random.normal(kx, (BATCH, ENCODED), jnp.float32)
    weight = jax.random.normal(kw, (OUT, ENCODED), jnp.float32) * 0.05
    bias = jax.random.normal(kb, (OUT,), jnp.float32) * 0.05

    # Pure-JAX reference (torch nn.Linear semantics).
    ref = jax.block_until_ready(x @ weight.T + bias)

    # f32 path: tiled, lane-dense (tn=128 -> 2 grid steps, "parallel").
    out = jax.block_until_ready(icm_target_forward(x, weight, bias, tn=128))
    assert out.shape == (BATCH, OUT), out.shape
    np.testing.assert_allclose(np.asarray(out), np.asarray(ref),
                               rtol=2e-3, atol=2e-3)

    # bf16 weight-streaming path (halves HBM traffic on big layers); f32
    # accumulation on the MXU keeps the error well inside tolerance.
    out_bf16 = jax.block_until_ready(
        icm_target_forward(x, weight, bias, tn=128,
                           weight_dtype=jnp.bfloat16))
    np.testing.assert_allclose(np.asarray(out_bf16), np.asarray(ref),
                               rtol=3e-2, atol=3e-2)

    print("KERNEL_OK")
</pallas_src>

<mosaic_0001>
module attributes {stable_mosaic.version = 11 : i64} {
  func.func @_linear_kernel(%arg0: i32, %arg1: memref<8x64xf32, #tpu.memory_space<vmem>>, %arg2: memref<64x128xf32, #tpu.memory_space<vmem>>, %arg3: memref<1x128xf32, #tpu.memory_space<vmem>>, %arg4: memref<8x128xf32, #tpu.memory_space<vmem>>) attributes {dimension_semantics = [#tpu.dimension_semantics<parallel>], iteration_bounds = array<i64: 2>, scalar_prefetch = 0 : i64, scratch_operands = 0 : i64, tpu.core_type = #tpu.core_type<tc>, window_params = [{pipeline_mode = #tpu.pipeline_mode<synchronous>, transform_indices = @transform_0, window_bounds = array<i64: 8, 64>}, {transform_indices = @transform_1, window_bounds = array<i64: 64, 128>}, {transform_indices = @transform_2, window_bounds = array<i64: 1, 128>}, {transform_indices = @transform_3, window_bounds = array<i64: 8, 128>}]} {
    %c0 = arith.constant 0 : index
    %c0_0 = arith.constant 0 : index
    %0 = vector.load %arg1[%c0, %c0_0] : memref<8x64xf32, #tpu.memory_space<vmem>>, vector<8x64xf32>
    %c0_1 = arith.constant 0 : index
    %c0_2 = arith.constant 0 : index
    %1 = vector.load %arg2[%c0_1, %c0_2] : memref<64x128xf32, #tpu.memory_space<vmem>>, vector<64x128xf32>
    %cst = arith.constant dense<0.000000e+00> : vector<8x128xf32>
    %2 = tpu.matmul %0, %1, %cst {dimension_numbers = #tpu.dot_dimension_numbers<[1], [0], [0], [1], [0, 0, 1, 1], [], []>} : vector<8x64xf32>, vector<64x128xf32>, vector<8x128xf32> -> vector<8x128xf32>
    %c0_3 = arith.constant 0 : index
    %c0_4 = arith.constant 0 : index
    %3 = vector.load %arg3[%c0_3, %c0_4] : memref<1x128xf32, #tpu.memory_space<vmem>>, vector<1x128xf32>
    %4 = vector.broadcast %3 : vector<1x128xf32> to vector<8x128xf32>
    %5 = arith.addf %2, %4 : vector<8x128xf32>
    %c0_5 = arith.constant 0 : index
    %c0_6 = arith.constant 0 : index
    %6 = vector.load %arg4[%c0_5, %c0_6] : memref<8x128xf32, #tpu.memory_space<vmem>>, vector<8x128xf32>
    tpu.vector_store %arg4[%c0_5, %c0_6], %5 {strides = array<i32>} : memref<8x128xf32, #tpu.memory_space<vmem>>, vector<8x128xf32>,
    return
  }
  func.func @transform_0(%arg0: i32) -> (i32, i32) {
    %c0_i32 = arith.constant 0 : i32
    %c0_i32_0 = arith.constant 0 : i32
    %c0_i32_1 = arith.constant 0 : i32
    return %c0_i32, %c0_i32_0 : i32, i32
  }
  func.func @transform_1(%arg0: i32) -> (i32, i32) {
    %c0_i32 = arith.constant 0 : i32
    %c0_i32_0 = arith.constant 0 : i32
    return %c0_i32, %arg0 : i32, i32
  }
  func.func @transform_2(%arg0: i32) -> (i32, i32) {
    %c0_i32 = arith.constant 0 : i32
    %c0_i32_0 = arith.constant 0 : i32
    return %c0_i32, %arg0 : i32, i32
  }
  func.func @transform_3(%arg0: i32) -> (i32, i32) {
    %c0_i32 = arith.constant 0 : i32
    %c0_i32_0 = arith.constant 0 : i32
    return %c0_i32, %arg0 : i32, i32
  }
}

</mosaic_0001>

<bundles_post_ra>
// kernel: tpu_custom_call.1
= control target key start
LH: loop header
LB: loop body
LE: loop exit
PB: predicated region body
PF: predicated region fallthrough
CT: control target
= control target key end

     0   :  { %8 = vsyncpa [#allocation3], 0  ;;  %s829_s0 = inlined_call_operand.hbm [shape: f32[8,64], index: 0, kind: input, shape index: {}]   ;;  %s830_s1 = inlined_call_operand.hbm [shape: f32[64,256], index: 1, kind: input, shape index: {}]   ;;  %s831_s2 = inlined_call_operand.hbm [shape: f32[1,256], index: 2, kind: input, shape index: {}]   ;;  %s832_s3 = inlined_call_operand.hbm [shape: f32[8,256], index: 3, kind: output, shape index: {}]  }
   0x1   :  { %9 = vsyncpa [#allocation6], 0 }
   0x2   :  { %11 = vsyncpa [#allocation6 + $0x1], 0 }
   0x3   :  { %12 = vsyncpa [#allocation4], 0 }
   0x4   :  { %14 = vsyncpa [#allocation4 + $0x1], 0  ;;  %s656_s12 = smov 0   ;;  %s658_s13 = smov 0  }
   0x5   :  { %s660_s14 = smov 0   ;;  %s662_s15 = smov 0  }
   0x6 LB: > { %s677_s16 = sadd.s32 1, %s630_s15   ;;  %s48_s17 = sadd.s32 1, %s626_s14  ;;  %s630_s15 = sphi %s662_s15, %s845_s15   ;;  %s626_s14 = sphi %s660_s14, %s844_s14   ;;  %s622_s13 = sphi %s658_s13, %s843_s13   ;;  %s618_s12 = sphi %s656_s12, %s842_s12  }
   0x7   : > { %s45_s18 = ssub.s32 %s630_s15, %s677_s16  ;;  %p55_p0 = scmp.ne.s32.totalorder %s626_s14, %s622_s13 }
   0x8   : > { %p46_p1 = scmp.eq.s32.totalorder %s45_s18, 0  ;;  %p56_p2 = scmp.eq.s32.totalorder %s630_s15, 0 }
   0x9   : > { %p430_p4 = scmp.lt.s32.totalorder %s630_s15, 2  ;;  %s149_s20 = sand.u32 1, %s630_s15  }
   0xa   : > { %s688_s19 = scalar_select %p46_p1, %s626_s14, %s48_s17  }
   0xb   : > { %p57_p5 = por %p56_p2, %p55_p0  ;;  %s151_s21 = sand.u32 1, %s626_s14  }
   0xc   : > { %s393_s22 = sshll.u32 %s151_s21, 6  ;;  %s394_s23 = sshll.u32 %s630_s15, 3 }
   0xd   : > { %s157_s26 = scalar_lea.hbm %s830_s1, %s394_s23  ;;  %s153_s28 = scalar_lea.vmem [#allocation5], %s393_s22 }
   0xe   : > { %s158_s27 = sshll.u32 %s157_s26, 4  ;;  %s160_s29 = sshll.u32 %s153_s28, 4  ;;  %s159_s27 = int_to_ptr.hbm [resolvable:$true] %s158_s27  ;;  %s161_s29 = int_to_ptr.vmem [resolvable:$true] %s160_s29 }
   0xf   : > { %p703_p6 = pnand %p430_p4, %p57_p5  ;;  %s707_s4 = scalar_lea.sflag [#allocation6], %s149_s20 }
  0x10   : > { %s470_s5 = sshra.s32 %s159_s27, 4  ;;  %s477_s9 = scalar_lea.hbm %s830_s1, 128  ;;  %s471_s5 = int_to_ptr.hbm [resolvable:$true] %s470_s5 }
  0x11   : > { %s472_s6 = scalar_lea.hbm %s471_s5, 64  ;;  %p474_p8 = pneg %p703_p6 }
  0x12   : > { %p473_p7 = scmp.ne.s32.totalorder %s471_s5, %s472_s6  ;;  %p478_p11 = scmp.lt.s32.totalorder %s471_s5, %s830_s1 }
  0x13   : > { %p479_p12 = scmp.lt.s32.totalorder %s477_s9, %s472_s6 }
  0x14   : > { %p475_p9 = pnand %p474_p8, %p473_p7 }
  0x15   : > { %p480_p13 = por %p479_p12, %p478_p11 }
  0x16   : > { %p476_p10 = pneg %p475_p9 }
  0x18   : > { %p481_p1 = pnand %p480_p13, %p476_p10 }
  0x1a   : > { %484 = shalt.err (!%p481_p1)
}
  0x1b   : > { %s632_s17 = smov 256   ;;  %s633_s18 = smov 128  }
  0x1c   : > { %s634_s20 = smov 8   ;;  %s724_s22 = sadd.s32 4294967295, %s630_s15  }
  0x1d   : > { %421 = dma.hbm_to_vmem [thread:$0]  (!%p703_p6), %s159_s27, 1024, %s161_s29, %s707_s4, %s632_s17, %s633_s18, %s634_s20  }
  0x1e   : > { %s389_s23 = sadd.s32 4294967294, %s630_s15   ;;  %p61_p2 = scmp.ne.s32.totalorder %s622_s13, %s618_s12 }
  0x1f   : > { %p833_p4 = scmp.eq.s32.totalorder %s724_s22, 0  ;;  %p111_p5 = scmp.eq.s32.totalorder %s724_s22, 1 }
  0x20   : > { %p117_p7 = scmp.eq.s32.totalorder %s389_s23, 1  ;;  %p390_p9 = scmp.ge.s32.totalorder %s630_s15, 1 }
  0x21   : > { %p734_p10 = por %p833_p4, %p61_p2  ;;  %p741_p11 = por %p111_p5, %p55_p0 }
  0x22   : > { %p745_p12 = por %p117_p7, %p61_p2  ;;  %p124_p13 = scmp.lt.s32.totalorder %s630_s15, 3 }
  0x23   : > { %s136_s29 = sshll.u32 %s829_s0, 4  ;;  %s635_s6 = smov [#allocation2]   ;;  %s137_s29 = int_to_ptr.hbm [resolvable:$true] %s136_s29 }
  0x24   : > { %p753_p1 = pnand %p390_p9, %p124_p13  ;;  %s138_s7 = sshll.u32 %s635_s6, 4  ;;  %s139_s7 = int_to_ptr.vmem [resolvable:$true] %s138_s7 }
  0x25   : > { %s176_s10 = scalar_lea.hbm %s831_s2, %s630_s15  ;;  %s173_s17 = scalar_lea.vmem [#allocation7], %s151_s21 }
  0x26   : > { %p414_p0 = pneg %p753_p1  ;;  %s178_s11 = sshll.u32 %s176_s10, 4  ;;  %s179_s11 = int_to_ptr.hbm [resolvable:$true] %s178_s11 }
  0x27   : > { %s180_s18 = sshll.u32 %s173_s17, 4  ;;  %s530_s20 = sshra.s32 %s179_s11, 4  ;;  %s181_s18 = int_to_ptr.vmem [resolvable:$true] %s180_s18  ;;  %s531_s20 = int_to_ptr.hbm [resolvable:$true] %s530_s20 }
  0x28   : > { %p415_p2 = pnand %p414_p0, %p833_p4  ;;  %s532_s23 = scalar_lea.hbm %s531_s20, 1 }
  0x29   : > { %p533_p5 = scmp.ne.s32.totalorder %s531_s20, %s532_s23  ;;  %s537_s6 = scalar_lea.hbm %s831_s2, 2 }
  0x2a   : > { %417 = dma.hbm_to_vmem [thread:$0]  (!%p415_p2), %s137_s29, 128, %s139_s7, [#allocation3]  }
  0x2b   : > { %p535_p7 = pnand %p533_p5, %p474_p8  ;;  %p538_p13 = scmp.lt.s32.totalorder %s531_s20, %s831_s2 }
  0x2c   : > { %p539_p0 = scmp.lt.s32.totalorder %s537_s6, %s532_s23 }
  0x2d   : > { %p536_p9 = pneg %p535_p7 }
  0x2e   : > { %p540_p3 = por %p539_p0, %p538_p13 }
  0x30   : > { %p541_p4 = pnand %p540_p3, %p536_p9 }
  0x32   : > { %544 = shalt.err (!%p541_p4)
}
  0x33   : > { %424 = dma.hbm_to_vmem [thread:$0]  (!%p703_p6), %s179_s11, 16, %s181_s18, %s707_s4  }
  0x34   : > { %189 = sbr.rel (%p753_p1) target bundleno = 209 (0xd1), region = 32  ;;  %p839_p8 = scmp.eq.s32.totalorder (!%p753_p1), %s724_s22, 0 }
  0x39   : > { %605 = dma.done.wait (%p839_p8), [#allocation3], 128   ;;  %p840_p2 = pmov %p839_p8 }
  0x3a   : > { %s196_s21 = sand.u32 1, %s724_s22   ;;  %s787_s29 = sand.u32 1, %s622_s13  }
  0x3b   : > { %607 = vsyncadd (%p840_p2), [#allocation3], 4294967168  ;;  %s397_s7 = sshll.u32 %s787_s29, 6  ;;  %s197_s30 = scalar_lea.sflag [#allocation6], %s196_s21 }
  0x3c   : > { %s200_s10 = scalar_lea.vmem [#allocation5], %s397_s7 }
  0x3d   : > { %609 = dma.done.wait (%p734_p10), %s197_s30, 1040  }
  0x3e   : > { %611 = vsyncadd (%p734_p10), %s197_s30, 4294966256  ;;  %v245_v0 = vld [vmem:[%s200_s10 + $0x38] sm:$0xff]  ;;  %v244_v1 = vld [vmem:[%s200_s10 + $0x30] sm:$0xff]  ;;  %s209_s4 = scalar_lea.vmem [#allocation7], %s787_s29  ;;  %vm250_vm0 = vcmask 523264   ;;  %s398_s24 = sshll.u32 %s787_s29, 3 }
  0x3f   : > { %262 = vmatpush.msra.mxu0 %v245_v0  ;;  %v243_v2 = vld [vmem:[%s200_s10 + $0x28] sm:$0xff]  ;;  %v242_v3 = vld [vmem:[%s200_s10 + $0x20] sm:$0xff]  ;;  %v241_v4 = vld [vmem:[%s200_s10 + $0x18] sm:$0xff]  ;;  %s401_s5 = sshll.u32 %s724_s22, 3  ;;  %s236_s20 = scalar_lea.vmem [#allocation8], %s398_s24 }
  0x40   : > { %v240_v5 = vld [vmem:[%s200_s10 + $0x10] sm:$0xff]  ;;  %v239_v6 = vld [vmem:[%s200_s10 + $0x8] sm:$0xff]  ;;  %v238_v7 = vld [vmem:[%s200_s10] sm:$0xff]  ;;  %s286_s18 = scalar_lea.hbm %s832_s3, %s401_s5  ;;  %s288_s23 = sshll.u32 %s236_s20, 4  ;;  %s289_s23 = int_to_ptr.vmem [resolvable:$true] %s288_s23 }
  0x41   : > { %263 = vmatpush.msra.mxu0 %v244_v1  ;;  %v237_v8 = vld [vmem:[#allocation2] sm:$0xff]  ;;  %s290_s27 = sshll.u32 %s286_s18, 4  ;;  %s276_s28 = scalar_lea.sflag [#allocation4], %s787_s29  ;;  %s291_s27 = int_to_ptr.hbm [resolvable:$true] %s290_s27 }
  0x42   : > { %v469_v9 = vld [vmem:[%s209_s4] ss:$0 sm:$0xff]  ;;  %s574_s6 = sshra.s32 %s291_s27, 4  ;;  %s580_s21 = scalar_lea.hbm %s832_s3, 16  ;;  %s575_s6 = int_to_ptr.hbm [resolvable:$true] %s574_s6 }
  0x43   : > { %264 = vmatpush.msra.mxu0 %v243_v2  ;;  %s576_s8 = scalar_lea.hbm %s575_s6, 8  ;;  %p581_p10 = scmp.lt.s32.totalorder %s575_s6, %s832_s3 }
  0x44   : > { %p577_p3 = scmp.ne.s32.totalorder %s575_s6, %s576_s8  ;;  %p582_p1 = scmp.lt.s32.totalorder %s580_s21, %s576_s8 }
  0x45   : > { %265 = vmatpush.msra.mxu0 %v242_v3 }
  0x46   : > { %p578_p6 = pnand %p577_p3, %p741_p11  ;;  %p583_p5 = por %p582_p1, %p581_p10 }
  0x47   : > { %266 = vmatpush.msra.mxu0 %v241_v4 }
  0x48   : > { %p579_p4 = pneg %p578_p6 }
  0x49   : > { %267 = vmatpush.msra.mxu0 %v240_v5 }
  0x4a   : > { %p584_p7 = pnand %p583_p5, %p579_p4 }
  0x4b   : > { %268 = vmatpush.msra.mxu0 %v239_v6 }
  0x4d   : > { %269 = vmatpush.msra.mxu0 %v238_v7 }
  0x4e   : > { %399 = vmatmul.msk.f32.vlgmr.msra.gmra.mxu0 %vm250_vm0, %v237_v8 }
  0xcb   : > { %v271_v10 = vpop.f32.mrf.mxu0 }
  0xcc   : > { %v272_v11 = vadd.f32 %v469_v9, %v271_v10 }
  0xce   : > { %274 = vst [vmem:[%s236_s20] sm:$0xff] %v272_v11 }
  0xcf   : > { %587 = shalt.err (!%p584_p7)
}
  0xd0   : > { %412 = dma.vmem_to_hbm [thread:$0]  (%p741_p11), %s289_s23, 128, %s291_s27, %s276_s28  }
  0xd1 PF: > { %s302_s29 = sand.u32 1, %s618_s12   ;;  %p841_p9 = scmp.ge.s32.totalorder %s630_s15, 2 }
  0xd2   : > { %s303_s10 = scalar_lea.sflag [#allocation4], %s302_s29 }
  0xd3   : > { %p426_p13 = pnand %p841_p9, %p745_p12 }
  0xd5   : > { %p427_p0 = pneg %p426_p13 }
  0xd7   : > { %613 = dma.done.wait (%p427_p0), %s303_s10, 128  }
  0xd8   : > { %615 = vsyncadd (%p427_p0), %s303_s10, 4294967168  ;;  %p17_p8 = scmp.ge.s32.totalorder %s677_s16, 4   ;;  %s842_s12 = smov %s622_s13 }
  0xd9   : > { %s843_s13 = smov %s626_s14  ;;  %s844_s14 = smov %s688_s19 }
  0xda   : > { %s845_s15 = smov %s677_s16  ;;  %19 = sbr.rel (!%p17_p8) target bundleno = 6 (0x6), region = 93 }
  0xdf   :  { %309 = vsyncpa [#allocation3], 1 }
  0xe0   :  { %311 = vsyncpa [#allocation3 + $0x1], 1 }
  0xe1   :  { %312 = vsyncpa [#allocation6], 1 }
  0xe2   :  { %314 = vsyncpa [#allocation6 + $0x1], 1 }
  0xe3   :  { %315 = vsyncpa [#allocation4], 1 }
  0xe4   :  { %317 = vsyncpa [#allocation4 + $0x1], 1 }

</bundles_post_ra>
